<compile_context>
chip_gen: v7x
topology: tpu7x:2x2x1
jax: 0.10.0
libtpu: 0.0.40
codegen_flags: <defaults>
</compile_context>

<pallas_src>
import functools
import math

import jax
import jax.numpy as jnp
from jax.experimental import pallas as pl
from jax.experimental.pallas import tpu as pltpu


def _range_bn_kernel(x_ref, gamma_ref, mmean_ref, mvar_ref,
                     y_ref, new_mean_ref, new_var_ref,
                     *, c_const, momentum):
    x = x_ref[...].astype(jnp.float32)                       # (N, TC)
    gamma = gamma_ref[...].astype(jnp.float32)               # (1, TC)

    # Batch statistics: reductions over the sublane (batch) axis go to the XLU.
    # (On v5e the sum could optionally be pushed to the idle MXU via
    #  jnp.dot(ones((1, N)), x); kept on the XLU here for exactness/simplicity.)
    mean = jnp.mean(x, axis=0, keepdims=True)                # (1, TC)
    rang = x - mean                                          # (N, TC)
    var = (jnp.max(rang, axis=0, keepdims=True)
           - jnp.min(rang, axis=0, keepdims=True))           # (1, TC)
    scale = c_const * var                                    # (1, TC)

    # Fold gamma / scale into one per-channel coefficient: a single reciprocal
    # per channel row replaces N*TC divides, and reusing `rang` avoids paying
    # the (1,TC)->(N,TC) broadcast + subtract a second time.
    # (approx=False keeps full f32 accuracy; it's only 1 x TC elements.)
    coef = gamma * pl.reciprocal(scale, approx=False)        # (1, TC)
    y_ref[...] = (rang * coef).astype(y_ref.dtype)

    new_mean_ref[...] = (momentum * mmean_ref[...].astype(jnp.float32)
                         + (1.0 - momentum) * mean).astype(new_mean_ref.dtype)
    new_var_ref[...] = (momentum * mvar_ref[...].astype(jnp.float32)
                        + (1.0 - momentum) * scale).astype(new_var_ref.dtype)


def _pick_channel_tile(n, c, itemsize, target_block_bytes):
    """Largest multiple of 128 lanes whose (n, TC) x-tile fits the budget."""
    max_tc = max(128, (target_block_bytes // max(1, n * itemsize)) // 128 * 128)
    c_pad128 = pl.cdiv(c, 128) * 128
    return min(int(max_tc), int(c_pad128))


def range_batch_norm_1d(x, gamma, moving_mean, moving_var,
                        eps=1e-05, momentum=0.9,
                        *, channel_tile=None,
                        target_block_bytes=4 * 1024 * 1024,
                        vmem_limit_bytes=48 * 1024 * 1024):
    """Training-mode RangeBatchNorm1d forward. Returns (y, new_mean, new_var).

    `eps` is accepted for signature parity with the PyTorch module but is not
    used in the training path (neither is it in the original range_batch_norm).
    """
    assert x.ndim == 2, "RangeBatchNorm1d expects (N, C) input"
    n, c = x.shape
    assert n >= 2, "range batch norm needs batch_size >= 2 (log(1) == 0)"

    c_const = (0.5 * 0.35 * (1.0 + (math.pi * math.log(4.0)) ** 0.5)
               / (2.0 * math.log(n)) ** 0.5)

    itemsize = jnp.dtype(x.dtype).itemsize
    if channel_tile is None:
        tc = _pick_channel_tile(n, c, itemsize, target_block_bytes)
    else:
        tc = int(channel_tile)
        assert tc % 128 == 0, "channel_tile must be a multiple of 128"
    # TODO(synk): add a two-pass (C_tiles, N_tiles) variant for very large N,
    # where an (n, 128) column no longer fits the VMEM budget.

    c_padded = pl.cdiv(c, tc) * tc
    if c_padded != c:
        pad = c_padded - c
        x_p = jnp.pad(x, ((0, 0), (0, pad)))
        gamma_p = jnp.pad(gamma, ((0, 0), (0, pad)), constant_values=1.0)
        mmean_p = jnp.pad(moving_mean, ((0, 0), (0, pad)))
        mvar_p = jnp.pad(moving_var, ((0, 0), (0, pad)), constant_values=1.0)
    else:
        x_p, gamma_p, mmean_p, mvar_p = x, gamma, moving_mean, moving_var

    kernel = functools.partial(_range_bn_kernel,
                               c_const=float(c_const),
                               momentum=float(momentum))

    x_spec = pl.BlockSpec((n, tc), lambda i: (0, i))
    row_spec = pl.BlockSpec((1, tc), lambda i: (0, i))

    y, new_mean, new_var = pl.pallas_call(
        kernel,
        grid=(c_padded // tc,),
        in_specs=[x_spec, row_spec, row_spec, row_spec],
        out_specs=(x_spec, row_spec, row_spec),
        out_shape=(
            jax.ShapeDtypeStruct((n, c_padded), x.dtype),
            jax.ShapeDtypeStruct((1, c_padded), jnp.float32),
            jax.ShapeDtypeStruct((1, c_padded), jnp.float32),
        ),
        compiler_params=pltpu.CompilerParams(
            dimension_semantics=("parallel",),
            vmem_limit_bytes=int(vmem_limit_bytes),
        ),
    )(x_p, gamma_p, mmean_p, mvar_p)

    if c_padded != c:
        y = y[:, :c]
        new_mean = new_mean[:, :c]
        new_var = new_var[:, :c]
    return y, new_mean, new_var


def _reference(x, gamma, moving_mean, moving_var, momentum=0.9):
    n = x.shape[0]
    c_const = (0.5 * 0.35 * (1.0 + (math.pi * math.log(4.0)) ** 0.5)
               / (2.0 * math.log(n)) ** 0.5)
    xf = x.astype(jnp.float32)
    mean = jnp.mean(xf, axis=0, keepdims=True)
    rang = xf - mean
    var = (jnp.max(rang, axis=0, keepdims=True)
           - jnp.min(rang, axis=0, keepdims=True))
    scale = c_const * var
    x_hat = (xf - mean) / scale
    y = (gamma * x_hat).astype(x.dtype)
    new_mean = momentum * moving_mean + (1.0 - momentum) * mean
    new_var = momentum * moving_var + (1.0 - momentum) * scale
    return y, new_mean, new_var


if __name__ == "__main__":
    key = jax.random.PRNGKey(0)
    N, C = 8, 32
    x = jax.random.normal(key, (N, C), dtype=jnp.float32)

    # Deterministic parameter init (matches nn.Module __init__): gamma=1,
    # moving_mean=0, moving_var=1.  beta=0 is unused in the forward pass.
    gamma = jnp.ones((1, C), dtype=jnp.float32)
    moving_mean = jnp.zeros((1, C), dtype=jnp.float32)
    moving_var = jnp.ones((1, C), dtype=jnp.float32)

    y, new_mean, new_var = range_batch_norm_1d(x, gamma, moving_mean, moving_var)
    jax.block_until_ready((y, new_mean, new_var))

    y_ref, mean_ref, var_ref = _reference(x, gamma, moving_mean, moving_var)
    assert jnp.allclose(y, y_ref, atol=1e-5, rtol=1e-5)
    assert jnp.allclose(new_mean, mean_ref, atol=1e-5, rtol=1e-5)
    assert jnp.allclose(new_var, var_ref, atol=1e-5, rtol=1e-5)

    print("KERNEL_OK")
</pallas_src>

<mosaic_0001>
module attributes {stable_mosaic.version = 11 : i64} {
  func.func @_range_bn_kernel(%arg0: i32, %arg1: memref<8x128xf32, #tpu.memory_space<vmem>>, %arg2: memref<1x128xf32, #tpu.memory_space<vmem>>, %arg3: memref<1x128xf32, #tpu.memory_space<vmem>>, %arg4: memref<1x128xf32, #tpu.memory_space<vmem>>, %arg5: memref<8x128xf32, #tpu.memory_space<vmem>>, %arg6: memref<1x128xf32, #tpu.memory_space<vmem>>, %arg7: memref<1x128xf32, #tpu.memory_space<vmem>>) attributes {dimension_semantics = [#tpu.dimension_semantics<parallel>], iteration_bounds = array<i64: 1>, scalar_prefetch = 0 : i64, scratch_operands = 0 : i64, tpu.core_type = #tpu.core_type<tc>, window_params = [{transform_indices = @transform_0, window_bounds = array<i64: 8, 128>}, {transform_indices = @transform_1, window_bounds = array<i64: 1, 128>}, {transform_indices = @transform_2, window_bounds = array<i64: 1, 128>}, {transform_indices = @transform_3, window_bounds = array<i64: 1, 128>}, {transform_indices = @transform_4, window_bounds = array<i64: 8, 128>}, {transform_indices = @transform_5, window_bounds = array<i64: 1, 128>}, {transform_indices = @transform_6, window_bounds = array<i64: 1, 128>}]} {
    %c0 = arith.constant 0 : index
    %c0_0 = arith.constant 0 : index
    %0 = vector.load %arg1[%c0, %c0_0] : memref<8x128xf32, #tpu.memory_space<vmem>>, vector<8x128xf32>
    %c0_1 = arith.constant 0 : index
    %c0_2 = arith.constant 0 : index
    %1 = vector.load %arg2[%c0_1, %c0_2] : memref<1x128xf32, #tpu.memory_space<vmem>>, vector<1x128xf32>
    %cst = arith.constant dense<0.000000e+00> : vector<128xf32>
    %2 = vector.multi_reduction <add>, %0, %cst [0] : vector<8x128xf32> to vector<128xf32>
    %3 = vector.shape_cast %2 : vector<128xf32> to vector<1x128xf32>
    %cst_3 = arith.constant 8.000000e+00 : f32
    %4 = vector.broadcast %cst_3 : f32 to vector<1x128xf32>
    %5 = arith.divf %3, %4 : vector<1x128xf32>
    %6 = vector.broadcast %5 : vector<1x128xf32> to vector<8x128xf32>
    %7 = arith.subf %0, %6 : vector<8x128xf32>
    %cst_4 = arith.constant dense<0xFF800000> : vector<128xf32>
    %8 = vector.multi_reduction <maximumf>, %7, %cst_4 [0] : vector<8x128xf32> to vector<128xf32>
    %9 = vector.shape_cast %8 : vector<128xf32> to vector<1x128xf32>
    %cst_5 = arith.constant dense<0x7F800000> : vector<128xf32>
    %10 = vector.multi_reduction <minimumf>, %7, %cst_5 [0] : vector<8x128xf32> to vector<128xf32>
    %11 = vector.shape_cast %10 : vector<128xf32> to vector<1x128xf32>
    %12 = arith.subf %9, %11 : vector<1x128xf32>
    %cst_6 = arith.constant 0.264894515 : f32
    %13 = vector.broadcast %cst_6 : f32 to vector<1x128xf32>
    %14 = arith.mulf %13, %12 : vector<1x128xf32>
    %15 = tpu.reciprocal %14 : vector<1x128xf32> -> vector<1x128xf32>
    %16 = arith.mulf %1, %15 : vector<1x128xf32>
    %17 = vector.broadcast %16 : vector<1x128xf32> to vector<8x128xf32>
    %18 = arith.mulf %7, %17 : vector<8x128xf32>
    %c0_7 = arith.constant 0 : index
    %c0_8 = arith.constant 0 : index
    %19 = vector.load %arg5[%c0_7, %c0_8] : memref<8x128xf32, #tpu.memory_space<vmem>>, vector<8x128xf32>
    tpu.vector_store %arg5[%c0_7, %c0_8], %18 {strides = array<i32>} : memref<8x128xf32, #tpu.memory_space<vmem>>, vector<8x128xf32>,
    %c0_9 = arith.constant 0 : index
    %c0_10 = arith.constant 0 : index
    %20 = vector.load %arg3[%c0_9, %c0_10] : memref<1x128xf32, #tpu.memory_space<vmem>>, vector<1x128xf32>
    %cst_11 = arith.constant 0.899999976 : f32
    %21 = vector.broadcast %cst_11 : f32 to vector<1x128xf32>
    %22 = arith.mulf %21, %20 : vector<1x128xf32>
    %cst_12 = arith.constant 1.000000e-01 : f32
    %23 = vector.broadcast %cst_12 : f32 to vector<1x128xf32>
    %24 = arith.mulf %23, %5 : vector<1x128xf32>
    %25 = arith.addf %22, %24 : vector<1x128xf32>
    %c0_13 = arith.constant 0 : index
    %c0_14 = arith.constant 0 : index
    %26 = vector.load %arg6[%c0_13, %c0_14] : memref<1x128xf32, #tpu.memory_space<vmem>>, vector<1x128xf32>
    tpu.vector_store %arg6[%c0_13, %c0_14], %25 {strides = array<i32>} : memref<1x128xf32, #tpu.memory_space<vmem>>, vector<1x128xf32>,
    %c0_15 = arith.constant 0 : index
    %c0_16 = arith.constant 0 : index
    %27 = vector.load %arg4[%c0_15, %c0_16] : memref<1x128xf32, #tpu.memory_space<vmem>>, vector<1x128xf32>
    %cst_17 = arith.constant 0.899999976 : f32
    %28 = vector.broadcast %cst_17 : f32 to vector<1x128xf32>
    %29 = arith.mulf %28, %27 : vector<1x128xf32>
    %cst_18 = arith.constant 1.000000e-01 : f32
    %30 = vector.broadcast %cst_18 : f32 to vector<1x128xf32>
    %31 = arith.mulf %30, %14 : vector<1x128xf32>
    %32 = arith.addf %29, %31 : vector<1x128xf32>
    %c0_19 = arith.constant 0 : index
    %c0_20 = arith.constant 0 : index
    %33 = vector.load %arg7[%c0_19, %c0_20] : memref<1x128xf32, #tpu.memory_space<vmem>>, vector<1x128xf32>
    tpu.vector_store %arg7[%c0_19, %c0_20], %32 {strides = array<i32>} : memref<1x128xf32, #tpu.memory_space<vmem>>, vector<1x128xf32>,
    return
  }
  func.func @transform_0(%arg0: i32) -> (i32, i32) {
    %c0_i32 = arith.constant 0 : i32
    %c0_i32_0 = arith.constant 0 : i32
    return %c0_i32, %arg0 : i32, i32
  }
  func.func @transform_1(%arg0: i32) -> (i32, i32) {
    %c0_i32 = arith.constant 0 : i32
    %c0_i32_0 = arith.constant 0 : i32
    return %c0_i32, %arg0 : i32, i32
  }
  func.func @transform_2(%arg0: i32) -> (i32, i32) {
    %c0_i32 = arith.constant 0 : i32
    %c0_i32_0 = arith.constant 0 : i32
    return %c0_i32, %arg0 : i32, i32
  }
  func.func @transform_3(%arg0: i32) -> (i32, i32) {
    %c0_i32 = arith.constant 0 : i32
    %c0_i32_0 = arith.constant 0 : i32
    return %c0_i32, %arg0 : i32, i32
  }
  func.func @transform_4(%arg0: i32) -> (i32, i32) {
    %c0_i32 = arith.constant 0 : i32
    %c0_i32_0 = arith.constant 0 : i32
    return %c0_i32, %arg0 : i32, i32
  }
  func.func @transform_5(%arg0: i32) -> (i32, i32) {
    %c0_i32 = arith.constant 0 : i32
    %c0_i32_0 = arith.constant 0 : i32
    return %c0_i32, %arg0 : i32, i32
  }
  func.func @transform_6(%arg0: i32) -> (i32, i32) {
    %c0_i32 = arith.constant 0 : i32
    %c0_i32_0 = arith.constant 0 : i32
    return %c0_i32, %arg0 : i32, i32
  }
}

</mosaic_0001>

<bundles_post_ra>
// kernel: tpu_custom_call.1
= control target key start
LH: loop header
LB: loop body
LE: loop exit
PB: predicated region body
PF: predicated region fallthrough
CT: control target
= control target key end

     0   :  { %12 = vsyncpa [#allocation3], 0  ;;  %s323_s0 = inlined_call_operand.hbm [shape: f32[8,128], index: 0, kind: input, shape index: {}]   ;;  %s324_s1 = inlined_call_operand.vmem [shape: f32[1,128], index: 1, kind: input, shape index: {}]   ;;  %s325_s2 = inlined_call_operand.vmem [shape: f32[1,128], index: 2, kind: input, shape index: {}]   ;;  %s326_s3 = inlined_call_operand.vmem [shape: f32[1,128], index: 3, kind: input, shape index: {}]   ;;  %s327_s4 = inlined_call_operand.hbm [shape: f32[8,128], index: 4, kind: output, shape index: {0}]   ;;  %s328_s5 = inlined_call_operand.hbm [shape: f32[1,128], index: 5, kind: output, shape index: {1}]   ;;  %s329_s6 = inlined_call_operand.hbm [shape: f32[1,128], index: 6, kind: output, shape index: {2}]  }
   0x1   :  { %13 = vsyncpa [#allocation4], 0 }
   0x2   :  { %14 = vsyncpa [#allocation7], 0  ;;  %s221_s21 = smov [#allocation2]   ;;  %s127_s25 = scalar_lea.hbm %s323_s0, 128 }
   0x3   :  { %s21_s22 = sshll.u32 %s221_s21, 4  ;;  %p128_p0 = scmp.ne.s32.totalorder %s323_s0, %s127_s25  ;;  %s22_s22 = int_to_ptr.vmem [resolvable:$true] %s21_s22 }
   0x4   :  { %p131_p1 = scmp.lt.u32.totalorder %s127_s25, %s323_s0 }
   0x6   :  { %p133_p2 = pnand %p131_p1, %p128_p0 }
   0x8   :  { %136 = shalt.err (!%p133_p2)
}
   0x9   :  { %s137_s30 = scalar_lea.vmem %s22_s22, 128  ;;  %p142_p4 = scmp.lt.s32.totalorder %s22_s22, %s22_s22 }
   0xa   :  { %p138_p3 = scmp.ne.s32.totalorder %s22_s22, %s137_s30  ;;  %p143_p5 = scmp.lt.s32.totalorder %s137_s30, %s137_s30 }
   0xc   :  { %p144_p6 = por %p143_p5, %p142_p4 }
   0xe   :  { %p145_p7 = pnand %p144_p6, %p138_p3 }
  0x10   :  { %148 = shalt.err (!%p145_p7)
}
  0x11   :  { %24 = dma.hbm_to_vmem [thread:$0]  %s323_s0, 128, %s22_s22, [#allocation3]  }
  0x12   :  { %215 = dma.done.wait [#allocation3], 128  }
  0x13   :  { %216 = vsyncadd [#allocation3], 4294967168  ;;  %v34_v0 = vld [vmem:[#allocation2] sm:$0xff]  ;;  %s222_s11 = smov [#allocation6]  }
  0x14   :  { %v36_v1 = vrot.slane %v34_v0, 4  ;;  %v69_v6 = vld [vmem:[%s325_s2] sm:$0x1]  ;;  %s95_s12 = sshll.u32 %s222_s11, 4  ;;  %s96_s12 = int_to_ptr.vmem [resolvable:$true] %s95_s12 }
  0x15   :  { %v70_v9 = vmul.f32 0.9, %v69_v6  ;;  %s149_s0 = scalar_lea.vmem %s96_s12, 16  ;;  %s153_s2 = scalar_lea.vmem %s96_s12, 32 }
  0x16   :  { %v37_v2 = vadd.f32 %v36_v1, %v34_v0  ;;  %p150_p8 = scmp.ne.s32.totalorder %s96_s12, %s149_s0  ;;  %p154_p9 = scmp.lt.s32.totalorder %s96_s12, %s96_s12 }
  0x17   :  { %p155_p10 = scmp.lt.s32.totalorder %s153_s2, %s149_s0 }
  0x18   :  { %v38_v3 = vrot.slane %v37_v2, 2 }
  0x19   :  { %p156_p11 = por %p155_p10, %p154_p9 }
  0x1a   :  { %v39_v4 = vadd.f32 %v38_v3, %v37_v2 }
  0x1b   :  { %p157_p12 = pnand %p156_p11, %p150_p8 }
  0x1c   :  { %v40_v5 = vrot.slane %v39_v4, 1 }
  0x1e   :  { %v41_v7 = vadd.f32 %v40_v5, %v39_v4 }
  0x20   :  { %v43_v8 = vmul.f32 0.125, %v41_v7 }
  0x22   :  { %v275_v10 = vsub.f32 %v34_v0, %v43_v8  ;;  %v71_v11 = vmul.f32 0.1, %v43_v8 }
  0x24   :  { %v45_v12 = vrot.slane %v275_v10, 4  ;;  %v72_v13 = vadd.f32 %v71_v11, %v70_v9 }
  0x26   :  { %v46_v14 = vmax.f32 %v275_v10, %v45_v12  ;;  %v52_v15 = vmin.f32 %v275_v10, %v45_v12  ;;  %73 = vst [vmem:[#allocation6] sm:$0x1] %v72_v13 }
  0x27   :  { %160 = shalt.err (!%p157_p12)
}
  0x28   :  { %s161_s15 = scalar_lea.hbm %s328_s5, 16 }
  0x29   :  { %p162_p13 = scmp.ne.s32.totalorder %s328_s5, %s161_s15  ;;  %p165_p0 = scmp.lt.u32.totalorder %s161_s15, %s328_s5 }
  0x2b   :  { %p167_p1 = pnand %p165_p0, %p162_p13 }
  0x2d   :  { %170 = shalt.err (!%p167_p1)
}
  0x2e   :  { %98 = dma.vmem_to_hbm [thread:$0]  %s96_s12, 16, %s328_s5, [#allocation7]   ;;  %v47_v16 = vrot.slane %v46_v14, 2  ;;  %v53_v17 = vrot.slane %v52_v15, 2  ;;  %v74_v24 = vld [vmem:[%s326_s3] sm:$0x1]  ;;  %v62_v29 = vlaneseq }
  0x2f   :  { %v75_v27 = vmul.f32 0.9, %v74_v24  ;;  %s223_s24 = smov [#allocation8]  }
  0x30   :  { %v48_v18 = vmax.f32 %v46_v14, %v47_v16  ;;  %v54_v19 = vmin.f32 %v52_v15, %v53_v17  ;;  %s105_s25 = sshll.u32 %s223_s24, 4  ;;  %v63_v31 = vshrl.u32 %v62_v29, 7  ;;  %s106_s25 = int_to_ptr.vmem [resolvable:$true] %s105_s25 }
  0x31   :  { %s171_s5 = scalar_lea.vmem %s106_s25, 16  ;;  %s175_s26 = scalar_lea.vmem %s106_s25, 32 }
  0x32   :  { %v49_v20 = vrot.slane %v48_v18, 1  ;;  %v55_v21 = vrot.slane %v54_v19, 1  ;;  %p172_p2 = scmp.ne.s32.totalorder %s106_s25, %s171_s5  ;;  %p176_p3 = scmp.lt.s32.totalorder %s106_s25, %s106_s25 }
  0x33   :  { %p177_p4 = scmp.lt.s32.totalorder %s175_s26, %s171_s5 }
  0x34   :  { %v50_v22 = vmax.f32 %v48_v18, %v49_v20  ;;  %v56_v23 = vmin.f32 %v54_v19, %v55_v21 }
  0x35   :  { %p178_p5 = por %p177_p4, %p176_p3 }
  0x36   :  { %v57_v25 = vsub.f32 %v50_v22, %v56_v23 }
  0x37   :  { %p179_p6 = pnand %p178_p5, %p172_p2 }
  0x38   :  { %v58_v26 = vmul.f32 0.26489452, %v57_v25 }
  0x3a   :  { %125 = vrcp.f32 %v58_v26  ;;  %v76_v28 = vmul.f32 0.1, %v58_v26 }
  0x3c   :  { %v77_v30 = vadd.f32 %v76_v28, %v75_v27 }
  0x3e   :  { %78 = vst [vmem:[#allocation8] sm:$0x1] %v77_v30 }
  0x3f   :  { %182 = shalt.err (!%p179_p6)
}
  0x40   :  { %s183_s28 = scalar_lea.hbm %s329_s6, 16 }
  0x41   :  { %p184_p7 = scmp.ne.s32.totalorder %s329_s6, %s183_s28  ;;  %p187_p8 = scmp.lt.u32.totalorder %s183_s28, %s329_s6 }
  0x43   :  { %p189_p9 = pnand %p187_p8, %p184_p7 }
  0x45   :  { %192 = shalt.err (!%p189_p9)
}
  0x46   :  { %108 = dma.vmem_to_hbm [thread:$0]  %s106_s25, 16, %s329_s6, [#allocation7]   ;;  %v35_v32 = vld [vmem:[%s324_s1] sm:$0x1]  ;;  %v64_v33 = vsub.s32 0, %v63_v31  ;;  %v126_v34 = vpop.eup %125 }
  0x47   :  { %v60_v35 = vmul.f32 %v126_v34, %v35_v32  ;;  %s224_s0 = smov [#allocation5]  }
  0x48   :  { %s85_s2 = sshll.u32 %s224_s0, 4  ;;  %s86_s2 = int_to_ptr.vmem [resolvable:$true] %s85_s2 }
  0x49   :  { %v65_v36 = vrot.slane %v60_v35, %v64_v33  ;;  %s193_s13 = scalar_lea.vmem %s86_s2, 128  ;;  %p198_p11 = scmp.lt.s32.totalorder %s86_s2, %s86_s2 }
  0x4a   :  { %p194_p10 = scmp.ne.s32.totalorder %s86_s2, %s193_s13  ;;  %p199_p12 = scmp.lt.s32.totalorder %s193_s13, %s193_s13 }
  0x4b   :  { %v67_v37 = vmul.f32 %v65_v36, %v275_v10 }
  0x4c   :  { %p200_p13 = por %p199_p12, %p198_p11 }
  0x4d   :  { %68 = vst [vmem:[#allocation5] sm:$0xff] %v67_v37 }
  0x4e   :  { %p201_p0 = pnand %p200_p13, %p194_p10 }
  0x50   :  { %204 = shalt.err (!%p201_p0)
}
  0x51   :  { %s205_s1 = scalar_lea.hbm %s327_s4, 128 }
  0x52   :  { %p206_p1 = scmp.ne.s32.totalorder %s327_s4, %s205_s1  ;;  %p209_p2 = scmp.lt.u32.totalorder %s205_s1, %s327_s4 }
  0x54   :  { %p211_p3 = pnand %p209_p2, %p206_p1 }
  0x56   :  { %214 = shalt.err (!%p211_p3)
}
  0x57   :  { %88 = dma.vmem_to_hbm [thread:$0]  %s86_s2, 128, %s327_s4, [#allocation4]  }
  0x58   :  { %217 = dma.done.wait [#allocation4], 128  }
  0x59   :  { %218 = vsyncadd [#allocation4], 4294967168 }
  0x5a   :  { %219 = dma.done.wait [#allocation7], 32  }
  0x5b   :  { %220 = vsyncadd [#allocation7], 4294967264 }
  0x5c   :  { %118 = vsyncpa [#allocation3], 1 }
  0x5d   :  { %119 = vsyncpa [#allocation4], 1 }
  0x5e   :  { %120 = vsyncpa [#allocation7], 1 }

</bundles_post_ra>
